<compile_context>
chip_gen: v7x
topology: tpu7x:2x2x1
jax: 0.10.0
libtpu: 0.0.40
codegen_flags: <defaults>
</compile_context>

<pallas_src>
import functools
import math

import jax
import jax.numpy as jnp
from jax.experimental import pallas as pl
from jax.experimental.pallas import tpu as pltpu


def _maybe_cast(x, dtype):
    return x if dtype is None or x.dtype == dtype else x.astype(dtype)


def _pick_seq_tile(s, *, sublane=8, max_resident=1024):
    """Prefer full-extent blocks; otherwise the largest sublane-friendly divisor."""
    if s <= max_resident:
        return s
    for t in (1024, 512, 256, 128, 64, 32, 16, 8):
        if t >= sublane and t % sublane == 0 and s % t == 0:
            return t
    return s


def _vmem_limit_bytes():
    """Generation-aware scoped-VMEM limit (~96-100 MiB on v5e/v6e, ~48 MiB on v7x)."""
    try:
        cap = int(pltpu.get_tpu_info().vmem_capacity_bytes)
        return max(32 * 1024 * 1024, min(cap * 3 // 4, 100 * 1024 * 1024))
    except Exception:
        return 48 * 1024 * 1024   # safe on every generation


# ----------------------------- kernel ----------------------------------------


def _fused_mha_kernel(q_ref, k_ref, v_ref,
                      wq_ref, bq_ref, wk_ref, bk_ref, wv_ref, bv_ref,
                      wo_ref, bo_ref,
                      o_ref,
                      kp_ref, vp_ref,
                      *, num_heads, dim_q, dim_k, operand_dtype):
    H, dq, dk = num_heads, dim_q, dim_k

    # ---- K/V projection: once per batch element (inner Sq axis is "arbitrary",
    # so program_id(1) == 0 marks the first Q tile of each batch element). The
    # projection matmuls are lane-dense (dim_in x H*dim_k); the per-head split
    # into the (H, Sk, dim_k) scratch layout is paid once per batch, not per tile.
    @pl.when(pl.program_id(1) == 0)
    def _():
        k_in = _maybe_cast(k_ref[0], operand_dtype)            # (Sk, dim_in)
        v_in = _maybe_cast(v_ref[0], operand_dtype)
        wk = _maybe_cast(wk_ref[...], operand_dtype)            # (dim_in, H*dk)
        wv = _maybe_cast(wv_ref[...], operand_dtype)
        kp = jnp.dot(k_in, wk, preferred_element_type=jnp.float32) + bk_ref[...]
        vp = jnp.dot(v_in, wv, preferred_element_type=jnp.float32) + bv_ref[...]
        for h in range(H):                                      # static unroll
            kp_ref[h] = kp[:, h * dk:(h + 1) * dk].astype(kp_ref.dtype)
            vp_ref[h] = vp[:, h * dk:(h + 1) * dk].astype(vp_ref.dtype)

    # ---- Q projection: all heads fused (lane-dense), 1/sqrt(dq) applied once.
    scale = 1.0 / math.sqrt(float(dq))
    q_in = _maybe_cast(q_ref[0], operand_dtype)                 # (tq, dim_in)
    wq = _maybe_cast(wq_ref[...], operand_dtype)                 # (dim_in, H*dq)
    qp = (jnp.dot(q_in, wq, preferred_element_type=jnp.float32)
          + bq_ref[...]) * scale                                 # fp32 (tq, H*dq)
    qp = _maybe_cast(qp, operand_dtype)
    qh = jnp.stack([qp[:, h * dq:(h + 1) * dq] for h in range(H)], axis=0)  # (H,tq,dq)

    kp = kp_ref[...]                                             # (H, Sk, dk)
    vp = vp_ref[...]

    # ---- Head-batched attention. Contracts the last dims directly (no kp.T
    # relayout); single batched dot_general per phase instead of H tiny matmuls.
    logits = jnp.einsum('hqd,hkd->hqk', qh, kp,
                        preferred_element_type=jnp.float32)      # (H, tq, Sk)

    # Numerically stable softmax in fp32; denominator reciprocal on the EUP.
    m = jnp.max(logits, axis=-1, keepdims=True)
    e = jnp.exp(logits - m)
    denom = jnp.sum(e, axis=-1, keepdims=True)
    probs = e * pl.reciprocal(denom, approx=True)                # ~1e-3 rel err

    ctx = jnp.einsum('hqk,hkd->hqd', _maybe_cast(probs, operand_dtype), vp,
                     preferred_element_type=jnp.float32)         # (H, tq, dk)

    # Concatenated heads form a lane-dense (tq, H*dk) slab for the output Linear.
    cat = jnp.concatenate([ctx[h] for h in range(H)], axis=-1)
    out = jnp.dot(_maybe_cast(cat, operand_dtype),
                  _maybe_cast(wo_ref[...], operand_dtype),
                  preferred_element_type=jnp.float32) + bo_ref[...]
    o_ref[0] = out.astype(o_ref.dtype)


# ----------------------------- wrapper ---------------------------------------


def multi_head_attention(Q, K, V, params, *, operand_dtype=jnp.bfloat16):
    """Q: (B, Sq, dim_in), K/V: (B, Sk, dim_in). Returns (B, Sq, dim_in).

    operand_dtype: dtype fed to the MXU (fp32 accumulation regardless).
    Default bfloat16 = native MXU path on v5e/v6e/v7x; pass jnp.float32 (or
    None) for bit-tighter parity with the fp32 PyTorch reference.
    """
    B, Sq, dim_in = Q.shape
    _, Sk, _ = K.shape
    num_heads, dim_q, dim_k = params["num_heads"], params["dim_q"], params["dim_k"]
    Hdq, Hdk = num_heads * dim_q, num_heads * dim_k
    assert dim_q == dim_k, "bmm(Qp, Kp^T) requires dim_q == dim_k"

    Wq, bq = params["Wq"], params["bq"]
    Wk, bk = params["Wk"], params["bk"]
    Wv, bv = params["Wv"], params["bv"]
    Wo, bo = params["Wo"], params["bo"]

    scratch_dtype = operand_dtype if operand_dtype is not None else Q.dtype
    sublane = 16 if jnp.dtype(scratch_dtype) == jnp.dtype(jnp.bfloat16) else 8
    tq = _pick_seq_tile(Sq, sublane=sublane)
    const2 = lambda b, i: (0, 0)

    cost = pl.CostEstimate(
        flops=(2 * 2 * B * Sk * dim_in * Hdk            # K/V projections
               + 2 * B * Sq * dim_in * Hdq              # Q projection
               + 2 * B * num_heads * Sq * Sk * dim_q    # logits
               + 2 * B * num_heads * Sq * Sk * dim_k    # probs @ V
               + 2 * B * Sq * Hdk * dim_in),            # output linear
        transcendentals=B * num_heads * Sq * Sk + B * num_heads * Sq,
        bytes_accessed=int(Q.size * Q.dtype.itemsize
                           + K.size * K.dtype.itemsize + V.size * V.dtype.itemsize
                           + sum(int(w.size * w.dtype.itemsize)
                                 for w in (Wq, bq, Wk, bk, Wv, bv, Wo, bo))
                           + B * Sq * dim_in * Q.dtype.itemsize))

    out = pl.pallas_call(
        functools.partial(_fused_mha_kernel, num_heads=num_heads,
                          dim_q=dim_q, dim_k=dim_k, operand_dtype=operand_dtype),
        out_shape=jax.ShapeDtypeStruct((B, Sq, dim_in), Q.dtype),
        grid=(B, Sq // tq),
        in_specs=[
            pl.BlockSpec((1, tq, dim_in), lambda b, i: (b, i, 0)),   # Q tile
            pl.BlockSpec((1, Sk, dim_in), lambda b, i: (b, 0, 0)),   # K (per batch)
            pl.BlockSpec((1, Sk, dim_in), lambda b, i: (b, 0, 0)),   # V (per batch)
            pl.BlockSpec(Wq.shape, const2),
            pl.BlockSpec(bq.shape, const2),
            pl.BlockSpec(Wk.shape, const2),
            pl.BlockSpec(bk.shape, const2),
            pl.BlockSpec(Wv.shape, const2),
            pl.BlockSpec(bv.shape, const2),
            pl.BlockSpec(Wo.shape, const2),
            pl.BlockSpec(bo.shape, const2),
        ],
        out_specs=pl.BlockSpec((1, tq, dim_in), lambda b, i: (b, i, 0)),
        scratch_shapes=[
            pltpu.VMEM((num_heads, Sk, dim_k), scratch_dtype),   # Kp, per-head layout
            pltpu.VMEM((num_heads, Sk, dim_k), scratch_dtype),   # Vp
        ],
        compiler_params=pltpu.CompilerParams(
            # batch axis "parallel" (>=2 steps shards across v7x's 2 TensorCores),
            # Sq axis "arbitrary" so the once-per-batch scratch init is sequential.
            dimension_semantics=("parallel", "arbitrary"),
            vmem_limit_bytes=_vmem_limit_bytes()),
        cost_estimate=cost,
    )(Q, K, V, Wq, bq, Wk, bk, Wv, bv, Wo, bo)
    return out


# ----------------------------- params / reference ----------------------------


def init_params(key, num_heads, dim_in, dim_q, dim_k, dtype=jnp.float32):
    """torch.nn.Linear-style init (U(-1/sqrt(fan_in), 1/sqrt(fan_in))).
    Per-head projection weights are stacked along the output dim (fused heads)
    and stored transposed: (fan_in, fan_out)."""
    ks = jax.random.split(key, 8)

    def u(k, shape, fan_in):
        bound = 1.0 / math.sqrt(fan_in)
        return jax.random.uniform(k, shape, dtype=dtype, minval=-bound, maxval=bound)

    Hdq, Hdk = num_heads * dim_q, num_heads * dim_k
    return {
        "num_heads": num_heads, "dim_q": dim_q, "dim_k": dim_k,
        "Wq": u(ks[0], (dim_in, Hdq), dim_in),
        "bq": u(ks[1], (1, Hdq), dim_in),
        "Wk": u(ks[2], (dim_in, Hdk), dim_in),
        "bk": u(ks[3], (1, Hdk), dim_in),
        "Wv": u(ks[4], (dim_in, Hdk), dim_in),
        "bv": u(ks[5], (1, Hdk), dim_in),
        "Wo": u(ks[6], (Hdk, dim_in), Hdk),
        "bo": u(ks[7], (1, dim_in), Hdk),
    }


def reference(Q, K, V, params):
    """Pure-JAX reference matching the PyTorch MultiHeadAttention forward."""
    H, dq, dk = params["num_heads"], params["dim_q"], params["dim_k"]
    qp = Q @ params["Wq"] + params["bq"]
    kp = K @ params["Wk"] + params["bk"]
    vp = V @ params["Wv"] + params["bv"]
    heads = []
    for h in range(H):
        qh = qp[..., h * dq:(h + 1) * dq]
        kh = kp[..., h * dk:(h + 1) * dk]
        vh = vp[..., h * dk:(h + 1) * dk]
        logits = jnp.einsum("bqd,bkd->bqk", qh, kh) / math.sqrt(dq)
        probs = jax.nn.softmax(logits, axis=-1)
        heads.append(jnp.einsum("bqk,bkd->bqd", probs, vh))
    cat = jnp.concatenate(heads, axis=-1)
    return cat @ params["Wo"] + params["bo"]


if __name__ == "__main__":
    B, Sq, Sk = 2, 8, 8
    N_heads, dim_in, dim_q, dim_k = 4, 32, 32, 32    # H*dim_k = 128 -> lane dense

    key = jax.random.PRNGKey(0)
    kq, kk, kv, kparams = jax.random.split(key, 4)
    Q = jax.random.normal(kq, (B, Sq, dim_in), dtype=jnp.float32)
    K = jax.random.normal(kk, (B, Sk, dim_in), dtype=jnp.float32)
    V = jax.random.normal(kv, (B, Sk, dim_in), dtype=jnp.float32)
    params = init_params(kparams, N_heads, dim_in, dim_q, dim_k)

    ref = reference(Q, K, V, params)

    # fp32-operand run: tight semantic check vs the PyTorch-equivalent reference
    # (tolerance covers the approx/EUP reciprocal in the softmax denominator).
    out_fp32 = jax.block_until_ready(
        multi_head_attention(Q, K, V, params, operand_dtype=jnp.float32))
    assert out_fp32.shape == (B, Sq, dim_in)
    assert jnp.allclose(out_fp32, ref, atol=1e-2, rtol=1e-2), "fp32 mismatch vs reference"

    # Default fast path: bf16 MXU operands, fp32 accumulate + fp32 softmax.
    out = jax.block_until_ready(multi_head_attention(Q, K, V, params))
    assert out.shape == (B, Sq, dim_in)
    assert jnp.allclose(out, ref, atol=6e-2, rtol=6e-2), "bf16 mismatch vs reference"

    print("KERNEL_OK")
</pallas_src>

<mosaic_0001>
module attributes {stable_mosaic.version = 11 : i64} {
  func.func @_fused_mha_kernel(%arg0: i32, %arg1: i32, %arg2: memref<1x8x32xf32, #tpu.memory_space<vmem>>, %arg3: memref<1x8x32xf32, #tpu.memory_space<vmem>>, %arg4: memref<1x8x32xf32, #tpu.memory_space<vmem>>, %arg5: memref<32x128xf32, #tpu.memory_space<vmem>>, %arg6: memref<1x128xf32, #tpu.memory_space<vmem>>, %arg7: memref<32x128xf32, #tpu.memory_space<vmem>>, %arg8: memref<1x128xf32, #tpu.memory_space<vmem>>, %arg9: memref<32x128xf32, #tpu.memory_space<vmem>>, %arg10: memref<1x128xf32, #tpu.memory_space<vmem>>, %arg11: memref<128x32xf32, #tpu.memory_space<vmem>>, %arg12: memref<1x32xf32, #tpu.memory_space<vmem>>, %arg13: memref<1x8x32xf32, #tpu.memory_space<vmem>>, %arg14: memref<4x8x32xf32, #tpu.memory_space<vmem>>, %arg15: memref<4x8x32xf32, #tpu.memory_space<vmem>>) attributes {dimension_semantics = [#tpu.dimension_semantics<parallel>, #tpu.dimension_semantics<arbitrary>], iteration_bounds = array<i64: 2, 1>, scalar_prefetch = 0 : i64, scratch_operands = 2 : i64, tpu.core_type = #tpu.core_type<tc>, window_params = [{transform_indices = @transform_0, window_bounds = array<i64: 1, 8, 32>}, {transform_indices = @transform_1, window_bounds = array<i64: 1, 8, 32>}, {transform_indices = @transform_2, window_bounds = array<i64: 1, 8, 32>}, {pipeline_mode = #tpu.pipeline_mode<synchronous>, transform_indices = @transform_3, window_bounds = array<i64: 32, 128>}, {pipeline_mode = #tpu.pipeline_mode<synchronous>, transform_indices = @transform_4, window_bounds = array<i64: 1, 128>}, {pipeline_mode = #tpu.pipeline_mode<synchronous>, transform_indices = @transform_5, window_bounds = array<i64: 32, 128>}, {pipeline_mode = #tpu.pipeline_mode<synchronous>, transform_indices = @transform_6, window_bounds = array<i64: 1, 128>}, {pipeline_mode = #tpu.pipeline_mode<synchronous>, transform_indices = @transform_7, window_bounds = array<i64: 32, 128>}, {pipeline_mode = #tpu.pipeline_mode<synchronous>, transform_indices = @transform_8, window_bounds = array<i64: 1, 128>}, {pipeline_mode = #tpu.pipeline_mode<synchronous>, transform_indices = @transform_9, window_bounds = array<i64: 128, 32>}, {pipeline_mode = #tpu.pipeline_mode<synchronous>, transform_indices = @transform_10, window_bounds = array<i64: 1, 32>}, {transform_indices = @transform_11, window_bounds = array<i64: 1, 8, 32>}]} {
    %c0_i32 = arith.constant 0 : i32
    %0 = arith.cmpi eq, %arg1, %c0_i32 : i32
    %1 = arith.extui %0 : i1 to i32
    %c0_i32_0 = arith.constant 0 : i32
    %2 = arith.cmpi ne, %1, %c0_i32_0 : i32
    scf.if %2 {
      %c0_26 = arith.constant 0 : index
      %c0_27 = arith.constant 0 : index
      %c0_28 = arith.constant 0 : index
      %52 = vector.load %arg3[%c0_26, %c0_27, %c0_28] : memref<1x8x32xf32, #tpu.memory_space<vmem>>, vector<1x8x32xf32>
      %53 = vector.shape_cast %52 : vector<1x8x32xf32> to vector<8x32xf32>
      %c0_29 = arith.constant 0 : index
      %c0_30 = arith.constant 0 : index
      %c0_31 = arith.constant 0 : index
      %54 = vector.load %arg4[%c0_29, %c0_30, %c0_31] : memref<1x8x32xf32, #tpu.memory_space<vmem>>, vector<1x8x32xf32>
      %55 = vector.shape_cast %54 : vector<1x8x32xf32> to vector<8x32xf32>
      %c0_32 = arith.constant 0 : index
      %c0_33 = arith.constant 0 : index
      %56 = vector.load %arg7[%c0_32, %c0_33] : memref<32x128xf32, #tpu.memory_space<vmem>>, vector<32x128xf32>
      %c0_34 = arith.constant 0 : index
      %c0_35 = arith.constant 0 : index
      %57 = vector.load %arg9[%c0_34, %c0_35] : memref<32x128xf32, #tpu.memory_space<vmem>>, vector<32x128xf32>
      %cst_36 = arith.constant dense<0.000000e+00> : vector<8x128xf32>
      %58 = tpu.matmul %53, %56, %cst_36 {dimension_numbers = #tpu.dot_dimension_numbers<[1], [0], [0], [1], [0, 0, 1, 1], [], []>} : vector<8x32xf32>, vector<32x128xf32>, vector<8x128xf32> -> vector<8x128xf32>
      %c0_37 = arith.constant 0 : index
      %c0_38 = arith.constant 0 : index
      %59 = vector.load %arg8[%c0_37, %c0_38] : memref<1x128xf32, #tpu.memory_space<vmem>>, vector<1x128xf32>
      %60 = vector.broadcast %59 : vector<1x128xf32> to vector<8x128xf32>
      %61 = arith.addf %58, %60 : vector<8x128xf32>
      %cst_39 = arith.constant dense<0.000000e+00> : vector<8x128xf32>
      %62 = tpu.matmul %55, %57, %cst_39 {dimension_numbers = #tpu.dot_dimension_numbers<[1], [0], [0], [1], [0, 0, 1, 1], [], []>} : vector<8x32xf32>, vector<32x128xf32>, vector<8x128xf32> -> vector<8x128xf32>
      %c0_40 = arith.constant 0 : index
      %c0_41 = arith.constant 0 : index
      %63 = vector.load %arg10[%c0_40, %c0_41] : memref<1x128xf32, #tpu.memory_space<vmem>>, vector<1x128xf32>
      %64 = vector.broadcast %63 : vector<1x128xf32> to vector<8x128xf32>
      %65 = arith.addf %62, %64 : vector<8x128xf32>
      %66 = vector.extract_strided_slice %61 {offsets = [0, 0], sizes = [8, 32], strides = [1, 1]} : vector<8x128xf32> to vector<8x32xf32>
      %c0_42 = arith.constant 0 : index
      %c0_43 = arith.constant 0 : index
      %c0_44 = arith.constant 0 : index
      %67 = vector.load %arg14[%c0_42, %c0_43, %c0_44] : memref<4x8x32xf32, #tpu.memory_space<vmem>>, vector<1x8x32xf32>
      %68 = vector.shape_cast %67 : vector<1x8x32xf32> to vector<8x32xf32>
      %69 = vector.shape_cast %66 : vector<8x32xf32> to vector<1x8x32xf32>
      tpu.vector_store %arg14[%c0_42, %c0_43, %c0_44], %69 {strides = array<i32>} : memref<4x8x32xf32, #tpu.memory_space<vmem>>, vector<1x8x32xf32>,
      %70 = vector.extract_strided_slice %65 {offsets = [0, 0], sizes = [8, 32], strides = [1, 1]} : vector<8x128xf32> to vector<8x32xf32>
      %c0_45 = arith.constant 0 : index
      %c0_46 = arith.constant 0 : index
      %c0_47 = arith.constant 0 : index
      %71 = vector.load %arg15[%c0_45, %c0_46, %c0_47] : memref<4x8x32xf32, #tpu.memory_space<vmem>>, vector<1x8x32xf32>
      %72 = vector.shape_cast %71 : vector<1x8x32xf32> to vector<8x32xf32>
      %73 = vector.shape_cast %70 : vector<8x32xf32> to vector<1x8x32xf32>
      tpu.vector_store %arg15[%c0_45, %c0_46, %c0_47], %73 {strides = array<i32>} : memref<4x8x32xf32, #tpu.memory_space<vmem>>, vector<1x8x32xf32>,
      %74 = vector.extract_strided_slice %61 {offsets = [0, 32], sizes = [8, 32], strides = [1, 1]} : vector<8x128xf32> to vector<8x32xf32>
      %c1 = arith.constant 1 : index
      %c0_48 = arith.constant 0 : index
      %c0_49 = arith.constant 0 : index
      %75 = vector.load %arg14[%c1, %c0_48, %c0_49] : memref<4x8x32xf32, #tpu.memory_space<vmem>>, vector<1x8x32xf32>
      %76 = vector.shape_cast %75 : vector<1x8x32xf32> to vector<8x32xf32>
      %77 = vector.shape_cast %74 : vector<8x32xf32> to vector<1x8x32xf32>
      tpu.vector_store %arg14[%c1, %c0_48, %c0_49], %77 {strides = array<i32>} : memref<4x8x32xf32, #tpu.memory_space<vmem>>, vector<1x8x32xf32>,
      %78 = vector.extract_strided_slice %65 {offsets = [0, 32], sizes = [8, 32], strides = [1, 1]} : vector<8x128xf32> to vector<8x32xf32>
      %c1_50 = arith.constant 1 : index
      %c0_51 = arith.constant 0 : index
      %c0_52 = arith.constant 0 : index
      %79 = vector.load %arg15[%c1_50, %c0_51, %c0_52] : memref<4x8x32xf32, #tpu.memory_space<vmem>>, vector<1x8x32xf32>
      %80 = vector.shape_cast %79 : vector<1x8x32xf32> to vector<8x32xf32>
      %81 = vector.shape_cast %78 : vector<8x32xf32> to vector<1x8x32xf32>
      tpu.vector_store %arg15[%c1_50, %c0_51, %c0_52], %81 {strides = array<i32>} : memref<4x8x32xf32, #tpu.memory_space<vmem>>, vector<1x8x32xf32>,
      %82 = vector.extract_strided_slice %61 {offsets = [0, 64], sizes = [8, 32], strides = [1, 1]} : vector<8x128xf32> to vector<8x32xf32>
      %c2 = arith.constant 2 : index
      %c0_53 = arith.constant 0 : index
      %c0_54 = arith.constant 0 : index
      %83 = vector.load %arg14[%c2, %c0_53, %c0_54] : memref<4x8x32xf32, #tpu.memory_space<vmem>>, vector<1x8x32xf32>
      %84 = vector.shape_cast %83 : vector<1x8x32xf32> to vector<8x32xf32>
      %85 = vector.shape_cast %82 : vector<8x32xf32> to vector<1x8x32xf32>
      tpu.vector_store %arg14[%c2, %c0_53, %c0_54], %85 {strides = array<i32>} : memref<4x8x32xf32, #tpu.memory_space<vmem>>, vector<1x8x32xf32>,
      %86 = vector.extract_strided_slice %65 {offsets = [0, 64], sizes = [8, 32], strides = [1, 1]} : vector<8x128xf32> to vector<8x32xf32>
      %c2_55 = arith.constant 2 : index
      %c0_56 = arith.constant 0 : index
      %c0_57 = arith.constant 0 : index
      %87 = vector.load %arg15[%c2_55, %c0_56, %c0_57] : memref<4x8x32xf32, #tpu.memory_space<vmem>>, vector<1x8x32xf32>
      %88 = vector.shape_cast %87 : vector<1x8x32xf32> to vector<8x32xf32>
      %89 = vector.shape_cast %86 : vector<8x32xf32> to vector<1x8x32xf32>
      tpu.vector_store %arg15[%c2_55, %c0_56, %c0_57], %89 {strides = array<i32>} : memref<4x8x32xf32, #tpu.memory_space<vmem>>, vector<1x8x32xf32>,
      %90 = vector.extract_strided_slice %61 {offsets = [0, 96], sizes = [8, 32], strides = [1, 1]} : vector<8x128xf32> to vector<8x32xf32>
      %c3 = arith.constant 3 : index
      %c0_58 = arith.constant 0 : index
      %c0_59 = arith.constant 0 : index
      %91 = vector.load %arg14[%c3, %c0_58, %c0_59] : memref<4x8x32xf32, #tpu.memory_space<vmem>>, vector<1x8x32xf32>
      %92 = vector.shape_cast %91 : vector<1x8x32xf32> to vector<8x32xf32>
      %93 = vector.shape_cast %90 : vector<8x32xf32> to vector<1x8x32xf32>
      tpu.vector_store %arg14[%c3, %c0_58, %c0_59], %93 {strides = array<i32>} : memref<4x8x32xf32, #tpu.memory_space<vmem>>, vector<1x8x32xf32>,
      %94 = vector.extract_strided_slice %65 {offsets = [0, 96], sizes = [8, 32], strides = [1, 1]} : vector<8x128xf32> to vector<8x32xf32>
      %c3_60 = arith.constant 3 : index
      %c0_61 = arith.constant 0 : index
      %c0_62 = arith.constant 0 : index
      %95 = vector.load %arg15[%c3_60, %c0_61, %c0_62] : memref<4x8x32xf32, #tpu.memory_space<vmem>>, vector<1x8x32xf32>
      %96 = vector.shape_cast %95 : vector<1x8x32xf32> to vector<8x32xf32>
      %97 = vector.shape_cast %94 : vector<8x32xf32> to vector<1x8x32xf32>
      tpu.vector_store %arg15[%c3_60, %c0_61, %c0_62], %97 {strides = array<i32>} : memref<4x8x32xf32, #tpu.memory_space<vmem>>, vector<1x8x32xf32>,
    } else {
    }
    %c0 = arith.constant 0 : index
    %c0_1 = arith.constant 0 : index
    %c0_2 = arith.constant 0 : index
    %3 = vector.load %arg2[%c0, %c0_1, %c0_2] : memref<1x8x32xf32, #tpu.memory_space<vmem>>, vector<1x8x32xf32>
    %4 = vector.shape_cast %3 : vector<1x8x32xf32> to vector<8x32xf32>
    %c0_3 = arith.constant 0 : index
    %c0_4 = arith.constant 0 : index
    %5 = vector.load %arg5[%c0_3, %c0_4] : memref<32x128xf32, #tpu.memory_space<vmem>>, vector<32x128xf32>
    %cst = arith.constant dense<0.000000e+00> : vector<8x128xf32>
    %6 = tpu.matmul %4, %5, %cst {dimension_numbers = #tpu.dot_dimension_numbers<[1], [0], [0], [1], [0, 0, 1, 1], [], []>} : vector<8x32xf32>, vector<32x128xf32>, vector<8x128xf32> -> vector<8x128xf32>
    %c0_5 = arith.constant 0 : index
    %c0_6 = arith.constant 0 : index
    %7 = vector.load %arg6[%c0_5, %c0_6] : memref<1x128xf32, #tpu.memory_space<vmem>>, vector<1x128xf32>
    %8 = vector.broadcast %7 : vector<1x128xf32> to vector<8x128xf32>
    %9 = arith.addf %6, %8 : vector<8x128xf32>
    %cst_7 = arith.constant 0.176776692 : f32
    %10 = vector.broadcast %cst_7 : f32 to vector<8x128xf32>
    %11 = arith.mulf %9, %10 : vector<8x128xf32>
    %12 = vector.extract_strided_slice %11 {offsets = [0, 0], sizes = [8, 32], strides = [1, 1]} : vector<8x128xf32> to vector<8x32xf32>
    %13 = vector.extract_strided_slice %11 {offsets = [0, 32], sizes = [8, 32], strides = [1, 1]} : vector<8x128xf32> to vector<8x32xf32>
    %14 = vector.extract_strided_slice %11 {offsets = [0, 64], sizes = [8, 32], strides = [1, 1]} : vector<8x128xf32> to vector<8x32xf32>
    %15 = vector.extract_strided_slice %11 {offsets = [0, 96], sizes = [8, 32], strides = [1, 1]} : vector<8x128xf32> to vector<8x32xf32>
    %16 = vector.shape_cast %12 : vector<8x32xf32> to vector<1x8x32xf32>
    %17 = vector.shape_cast %13 : vector<8x32xf32> to vector<1x8x32xf32>
    %18 = vector.shape_cast %14 : vector<8x32xf32> to vector<1x8x32xf32>
    %19 = vector.shape_cast %15 : vector<8x32xf32> to vector<1x8x32xf32>
    %20 = tpu.concatenate %16, %17, %18, %19 in 0 : vector<1x8x32xf32>, vector<1x8x32xf32>, vector<1x8x32xf32>, vector<1x8x32xf32> -> vector<4x8x32xf32>
    %c0_8 = arith.constant 0 : index
    %c0_9 = arith.constant 0 : index
    %c0_10 = arith.constant 0 : index
    %21 = vector.load %arg14[%c0_8, %c0_9, %c0_10] : memref<4x8x32xf32, #tpu.memory_space<vmem>>, vector<4x8x32xf32>
    %c0_11 = arith.constant 0 : index
    %c0_12 = arith.constant 0 : index
    %c0_13 = arith.constant 0 : index
    %22 = vector.load %arg15[%c0_11, %c0_12, %c0_13] : memref<4x8x32xf32, #tpu.memory_space<vmem>>, vector<4x8x32xf32>
    "tpu.trace_start"() <{level = 10 : i32, message = "hqd,hkd->hqk"}> : () -> ()
    %cst_14 = arith.constant dense<0.000000e+00> : vector<4x8x8xf32>
    %23 = tpu.matmul %20, %21, %cst_14 {dimension_numbers = #tpu.dot_dimension_numbers<[2], [2], [1], [1], [0, 0, 0, 1, 1, 1], [0], [0]>} : vector<4x8x32xf32>, vector<4x8x32xf32>, vector<4x8x8xf32> -> vector<4x8x8xf32>
    "tpu.trace_stop"() : () -> ()
    %cst_15 = arith.constant dense<0xFF800000> : vector<4x8xf32>
    %24 = vector.multi_reduction <maximumf>, %23, %cst_15 [2] : vector<4x8x8xf32> to vector<4x8xf32>
    %25 = vector.shape_cast %24 : vector<4x8xf32> to vector<4x8x1xf32>
    %26 = vector.broadcast %25 : vector<4x8x1xf32> to vector<4x8x8xf32>
    %27 = arith.subf %23, %26 : vector<4x8x8xf32>
    %28 = math.exp %27 : vector<4x8x8xf32>
    %cst_16 = arith.constant dense<0.000000e+00> : vector<4x8xf32>
    %29 = vector.multi_reduction <add>, %28, %cst_16 [2] : vector<4x8x8xf32> to vector<4x8xf32>
    %30 = vector.shape_cast %29 : vector<4x8xf32> to vector<4x8x1xf32>
    %31 = tpu.reciprocal %30 {approx = true} : vector<4x8x1xf32> -> vector<4x8x1xf32>
    %32 = vector.broadcast %31 : vector<4x8x1xf32> to vector<4x8x8xf32>
    %33 = arith.mulf %28, %32 : vector<4x8x8xf32>
    "tpu.trace_start"() <{level = 10 : i32, message = "hqk,hkd->hqd"}> : () -> ()
    %cst_17 = arith.constant dense<0.000000e+00> : vector<4x8x32xf32>
    %34 = tpu.matmul %33, %22, %cst_17 {dimension_numbers = #tpu.dot_dimension_numbers<[2], [1], [1], [2], [0, 0, 0, 1, 1, 2], [0], [0]>} : vector<4x8x8xf32>, vector<4x8x32xf32>, vector<4x8x32xf32> -> vector<4x8x32xf32>
    "tpu.trace_stop"() : () -> ()
    %35 = vector.extract_strided_slice %34 {offsets = [0, 0, 0], sizes = [1, 8, 32], strides = [1, 1, 1]} : vector<4x8x32xf32> to vector<1x8x32xf32>
    %36 = vector.shape_cast %35 : vector<1x8x32xf32> to vector<8x32xf32>
    %37 = vector.extract_strided_slice %34 {offsets = [1, 0, 0], sizes = [1, 8, 32], strides = [1, 1, 1]} : vector<4x8x32xf32> to vector<1x8x32xf32>
    %38 = vector.shape_cast %37 : vector<1x8x32xf32> to vector<8x32xf32>
    %39 = vector.extract_strided_slice %34 {offsets = [2, 0, 0], sizes = [1, 8, 32], strides = [1, 1, 1]} : vector<4x8x32xf32> to vector<1x8x32xf32>
    %40 = vector.shape_cast %39 : vector<1x8x32xf32> to vector<8x32xf32>
    %41 = vector.extract_strided_slice %34 {offsets = [3, 0, 0], sizes = [1, 8, 32], strides = [1, 1, 1]} : vector<4x8x32xf32> to vector<1x8x32xf32>
    %42 = vector.shape_cast %41 : vector<1x8x32xf32> to vector<8x32xf32>
    %43 = tpu.concatenate %36, %38, %40, %42 in 1 : vector<8x32xf32>, vector<8x32xf32>, vector<8x32xf32>, vector<8x32xf32> -> vector<8x128xf32>
    %c0_18 = arith.constant 0 : index
    %c0_19 = arith.constant 0 : index
    %44 = vector.load %arg11[%c0_18, %c0_19] : memref<128x32xf32, #tpu.memory_space<vmem>>, vector<128x32xf32>
    %cst_20 = arith.constant dense<0.000000e+00> : vector<8x32xf32>
    %45 = tpu.matmul %43, %44, %cst_20 {dimension_numbers = #tpu.dot_dimension_numbers<[1], [0], [0], [1], [0, 0, 1, 1], [], []>} : vector<8x128xf32>, vector<128x32xf32>, vector<8x32xf32> -> vector<8x32xf32>
    %c0_21 = arith.constant 0 : index
    %c0_22 = arith.constant 0 : index
    %46 = vector.load %arg12[%c0_21, %c0_22] : memref<1x32xf32, #tpu.memory_space<vmem>>, vector<1x32xf32>
    %47 = vector.broadcast %46 : vector<1x32xf32> to vector<8x32xf32>
    %48 = arith.addf %45, %47 : vector<8x32xf32>
    %c0_23 = arith.constant 0 : index
    %c0_24 = arith.constant 0 : index
    %c0_25 = arith.constant 0 : index
    %49 = vector.load %arg13[%c0_23, %c0_24, %c0_25] : memref<1x8x32xf32, #tpu.memory_space<vmem>>, vector<1x8x32xf32>
    %50 = vector.shape_cast %49 : vector<1x8x32xf32> to vector<8x32xf32>
    %51 = vector.shape_cast %48 : vector<8x32xf32> to vector<1x8x32xf32>
    tpu.vector_store %arg13[%c0_23, %c0_24, %c0_25], %51 {strides = array<i32>} : memref<1x8x32xf32, #tpu.memory_space<vmem>>, vector<1x8x32xf32>,
    return
  }
  func.func @transform_0(%arg0: i32, %arg1: i32) -> (i32, i32, i32) {
    %c0_i32 = arith.constant 0 : i32
    %c0_i32_0 = arith.constant 0 : i32
    return %arg0, %arg1, %c0_i32 : i32, i32, i32
  }
  func.func @transform_1(%arg0: i32, %arg1: i32) -> (i32, i32, i32) {
    %c0_i32 = arith.constant 0 : i32
    %c0_i32_0 = arith.constant 0 : i32
    %c0_i32_1 = arith.constant 0 : i32
    return %arg0, %c0_i32, %c0_i32_0 : i32, i32, i32
  }
  func.func @transform_2(%arg0: i32, %arg1: i32) -> (i32, i32, i32) {
    %c0_i32 = arith.constant 0 : i32
    %c0_i32_0 = arith.constant 0 : i32
    %c0_i32_1 = arith.constant 0 : i32
    return %arg0, %c0_i32, %c0_i32_0 : i32, i32, i32
  }
  func.func @transform_3(%arg0: i32, %arg1: i32) -> (i32, i32) {
    %c0_i32 = arith.constant 0 : i32
    %c0_i32_0 = arith.constant 0 : i32
    %c0_i32_1 = arith.constant 0 : i32
    return %c0_i32, %c0_i32_0 : i32, i32
  }
  func.func @transform_4(%arg0: i32, %arg1: i32) -> (i32, i32) {
    %c0_i32 = arith.constant 0 : i32
    %c0_i32_0 = arith.constant 0 : i32
    %c0_i32_1 = arith.constant 0 : i32
    return %c0_i32, %c0_i32_0 : i32, i32
  }
  func.func @transform_5(%arg0: i32, %arg1: i32) -> (i32, i32) {
    %c0_i32 = arith.constant 0 : i32
    %c0_i32_0 = arith.constant 0 : i32
    %c0_i32_1 = arith.constant 0 : i32
    return %c0_i32, %c0_i32_0 : i32, i32
  }
  func.func @transform_6(%arg0: i32, %arg1: i32) -> (i32, i32) {
    %c0_i32 = arith.constant 0 : i32
    %c0_i32_0 = arith.constant 0 : i32
    %c0_i32_1 = arith.constant 0 : i32
    return %c0_i32, %c0_i32_0 : i32, i32
  }
  func.func @transform_7(%arg0: i32, %arg1: i32) -> (i32, i32) {
    %c0_i32 = arith.constant 0 : i32
    %c0_i32_0 = arith.constant 0 : i32
    %c0_i32_1 = arith.constant 0 : i32
    return %c0_i32, %c0_i32_0 : i32, i32
  }
  func.func @transform_8(%arg0: i32, %arg1: i32) -> (i32, i32) {
    %c0_i32 = arith.constant 0 : i32
    %c0_i32_0 = arith.constant 0 : i32
    %c0_i32_1 = arith.constant 0 : i32
    return %c0_i32, %c0_i32_0 : i32, i32
  }
  func.func @transform_9(%arg0: i32, %arg1: i32) -> (i32, i32) {
    %c0_i32 = arith.constant 0 : i32
    %c0_i32_0 = arith.constant 0 : i32
    %c0_i32_1 = arith.constant 0 : i32
    return %c0_i32, %c0_i32_0 : i32, i32
  }
  func.func @transform_10(%arg0: i32, %arg1: i32) -> (i32, i32) {
    %c0_i32 = arith.constant 0 : i32
    %c0_i32_0 = arith.constant 0 : i32
    %c0_i32_1 = arith.constant 0 : i32
    return %c0_i32, %c0_i32_0 : i32, i32
  }
  func.func @transform_11(%arg0: i32, %arg1: i32) -> (i32, i32, i32) {
    %c0_i32 = arith.constant 0 : i32
    %c0_i32_0 = arith.constant 0 : i32
    return %arg0, %arg1, %c0_i32 : i32, i32, i32
  }
}

</mosaic_0001>

<bundles_post_ra>
// kernel: tpu_custom_call.1
= control target key start
LH: loop header
LB: loop body
LE: loop exit
PB: predicated region body
PF: predicated region fallthrough
CT: control target
= control target key end

     0   :  { %s2380_s0 = inlined_call_operand.vmem [shape: f32[2,8,32], index: 0, kind: input, shape index: {}]   ;;  %s2381_s1 = inlined_call_operand.vmem [shape: f32[2,8,32], index: 1, kind: input, shape index: {}]   ;;  %s2382_s2 = inlined_call_operand.vmem [shape: f32[2,8,32], index: 2, kind: input, shape index: {}]   ;;  %s2383_s3 = inlined_call_operand.vmem [shape: f32[32,128], index: 3, kind: input, shape index: {}]   ;;  %s2384_s4 = inlined_call_operand.vmem [shape: f32[1,128], index: 4, kind: input, shape index: {}]   ;;  %s2385_s5 = inlined_call_operand.vmem [shape: f32[32,128], index: 5, kind: input, shape index: {}]   ;;  %s2386_s6 = inlined_call_operand.vmem [shape: f32[1,128], index: 6, kind: input, shape index: {}]   ;;  %s2387_s7 = inlined_call_operand.vmem [shape: f32[32,128], index: 7, kind: input, shape index: {}]   ;;  %s2388_s8 = inlined_call_operand.vmem [shape: f32[1,128], index: 8, kind: input, shape index: {}]   ;;  %s2389_s9 = inlined_call_operand.vmem [shape: f32[128,32], index: 9, kind: input, shape index: {}]   ;;  %s2390_s10 = inlined_call_operand.vmem [shape: f32[1,32], index: 10, kind: input, shape index: {}]   ;;  %s2391_s11 = inlined_call_operand.hbm [shape: f32[2,8,32], index: 11, kind: output, shape index: {}]  }
   0x1   :  { %2393 = sst [smem:[#allocation7_spill]] %s2381_s1 }
   0x2   :  { %2394 = sst [smem:[#allocation8_spill]] %s2385_s5 }
   0x3   :  { %16 = vsyncpa [#allocation5], 0 }
   0x4   :  { %18 = vsyncpa [#allocation5 + $0x1], 0  ;;  %s2064_s17 = smov 0   ;;  %s2066_s18 = smov 0  }
   0x5   :  { %s2068_s19 = smov 0   ;;  %s2070_s20 = smov 0  }
   0x6   :  { %s2072_s21 = smov 0   ;;  %s2074_s22 = smov 0  }
   0x7 LB: > { %s1610_s23 = sadd.s32 4294967295, %s1995_s22   ;;  %s1611_s24 = sadd.s32 4294967294, %s1995_s22   ;;  %s1995_s22 = sphi %s2074_s22, %s24_s22   ;;  %s1991_s21 = sphi %s2072_s21, %s2404_s21   ;;  %s1987_s20 = sphi %s2070_s20, %s2403_s20   ;;  %s1983_s19 = sphi %s2068_s19, %s2402_s19   ;;  %s1979_s18 = sphi %s2066_s18, %s2401_s18   ;;  %s1975_s17 = sphi %s2064_s17, %s2400_s17  }
   0x8   : > { %s36_s25 = sadd.s32 1, %s1991_s21  ;;  %s293_s26 = sadd.s32 1, %s1983_s19 }
   0x9   : > { %p38_p0 = scmp.ge.s32.totalorder %s36_s25, 2  ;;  %p303_p1 = scmp.ne.s32.totalorder %s1983_s19, %s1979_s18 }
   0xa   : > { %p304_p2 = scmp.eq.s32.totalorder %s1610_s23, 1  ;;  %p309_p3 = scmp.ne.s32.totalorder %s1979_s18, %s1975_s17 }
   0xb   : > { %s2406_s25 = smov (%p38_p0, %s36_s25), 0  ;;  %p310_p5 = scmp.eq.s32.totalorder %s1611_s24, 1 }
   0xc   : > { %p2104_p4 = por %p304_p2, %p303_p1  ;;  %s288_s28 = ssub.s32 %s1991_s21, %s2406_s25 }
   0xd   : > { %p1614_p6 = scmp.ge.s32.totalorder %s1995_s22, 1  ;;  %p291_p7 = scmp.eq.s32.totalorder %s288_s28, 0 }
   0xe   : > { %p2111_p8 = por %p310_p5, %p309_p3  ;;  %p376_p9 = scmp.lt.s32.totalorder %s1995_s22, 3 }
   0xf   : > { %s2117_s30 = scalar_select %p291_p7, %s1983_s19, %s293_s26  }
  0x10   : > { %p377_p10 = pnand %p1614_p6, %p376_p9 }
  0x11   : > { %s2397_s5 = sld [smem:[#allocation8_spill]] (!%p377_p10)  ;;  %v1997_v3 = vmov (!%p377_p10), 0.0|0.0   ;;  %vm1998_vm0 = vmmov (!%p377_p10), 0   ;;  %v1999_v6 = vmov (!%p377_p10), 0.0   ;;  %p426_p11 = scmp.lt.s32.totalorder (!%p377_p10), %s1987_s20, 1  ;;  %v451_v8 = vld [vmem:[%s2387_s7] sm:$0xff] (!%p377_p10) }
  0x12   : > { %380 = sbr.rel (%p377_p10) target bundleno = 1468 (0x5bc), region = 64  ;;  %1798 = vmatprep.subr.bf16.mxu1 (!%p377_p10), %v1997_v3  ;;  %1698 = vmatprep.mubr.msk.f32.mxu1 (!%p377_p10), %vm1998_vm0, %v1999_v6  ;;  %v452_v9 = vld [vmem:[%s2387_s7 + $0x8] sm:$0xff] (!%p377_p10)  ;;  %s2398_s1 = sld [smem:[#allocation7_spill]] (!%p377_p10)  ;;  %vm462_vm1 = vcmask (!%p377_p10), 261120   ;;  %v453_v12 = vld [vmem:[%s2387_s7 + $0x10] sm:$0xff] (!%p377_p10)  ;;  %v454_v13 = vld [vmem:[%s2387_s7 + $0x18] sm:$0xff] (!%p377_p10) }
  0x13   : > { %1733 = vmatprep.subr.mxu0 (!%p377_p10), %v1999_v6  ;;  %1735 = vmatprep.mubr.msk.f32.mxu0 (!%p377_p10), %vm1998_vm0, %v1999_v6  ;;  %v1805_v11 = vpack.c.bf16 (!%p377_p10), %v452_v9, %v451_v8  ;;  %v1808_v14 = vpack.c.bf16 (!%p377_p10), %v454_v13, %v453_v12  ;;  %v651_v15 = vld [vmem:[%s2383_s3] sm:$0xff] (!%p377_p10)  ;;  %v652_v16 = vld [vmem:[%s2383_s3 + $0x8] sm:$0xff] (!%p377_p10)  ;;  %v653_v19 = vld [vmem:[%s2383_s3 + $0x10] sm:$0xff] (!%p377_p10)  ;;  %s2392_s12 = smov (!%p377_p10), 96   ;;  %s2002_s15 = smov (!%p377_p10), 64   ;;  %vm1052_vm2 = vcmask (!%p377_p10), 64512  }
  0x14   : > { %v1811_v18 = vpack.c.bf16 (!%p377_p10), %v652_v16, %v651_v15  ;;  %v654_v20 = vld [vmem:[%s2383_s3 + $0x18] sm:$0xff] (!%p377_p10)  ;;  %v1619_v23 = vld [vmem:[%s2386_s6] ss:$0 sm:$0xff] (!%p377_p10)  ;;  %s2399_s14 = smov (!%p377_p10), 96   ;;  %vm1402_vm3 = vcmask (!%p377_p10), 523264   ;;  %vm1404_vm4 = vcmask (!%p377_p10), 785408  }
  0x15   : > { %v1814_v21 = vpack.c.bf16 (!%p377_p10), %v654_v20, %v653_v19  ;;  %v1621_v27 = vld [vmem:[%s2388_s8] ss:$0 sm:$0xff] (!%p377_p10)  ;;  %s1639_s23 = sshll.u32 (!%p377_p10), %s1987_s20, 7 }
  0x16   : > { %v1623_v32 = vld [vmem:[%s2384_s4] ss:$0 sm:$0xff] (!%p377_p10)  ;;  %s2332_s13 = scalar_lea.hbm (!%p377_p10), %s2391_s11, %s1639_s23 }
  0x17   : > { %v447_v0 = vld [vmem:[%s2397_s5] sm:$0xff] (!%p377_p10)  ;;  %v448_v1 = vld [vmem:[%s2397_s5 + $0x8] sm:$0xff] (!%p377_p10)  ;;  %v449_v2 = vld [vmem:[%s2397_s5 + $0x10] sm:$0xff] (!%p377_p10) }
  0x18   : > { %v1799_v4 = vpack.c.bf16 (!%p377_p10), %v448_v1, %v447_v0  ;;  %v450_v5 = vld [vmem:[%s2397_s5 + $0x18] sm:$0xff] (!%p377_p10) }
  0x19   : > { %v1802_v7 = vpack.c.bf16 %v450_v5, %v449_v2  ;;  %s427_s28 = scalar_select %p426_p11, %s1987_s20, 1 }
  0x1a   : > { %1800 = vmatpush3.bf16.msra.mxu1 %v1799_v4  ;;  %s2003_s20 = smov [#allocation4]  }
  0x1b   : > { %1801 = vmatprep.subr.bf16.mxu1 %v1997_v3  ;;  %s2146_s16 = sshll.u32 %s427_s28, 3 }
  0x1c   : > { %s436_s26 = scalar_lea.vmem %s2398_s1, %s2146_s16  ;;  %s440_s24 = scalar_lea.vmem %s2382_s2, %s2146_s16 }
  0x1d   : > { %v445_v10 = vld [vmem:[%s436_s26] sm:$0xff]  ;;  %s432_s26 = scalar_lea.vmem %s2380_s0, %s2146_s16  ;;  %s2001_s16 = smov 32  }
  0x1e   : > { %1803 = vmatpush3.bf16.msra.mxu1 %v1802_v7  ;;  %v446_v17 = vld [vmem:[%s440_s24] sm:$0xff] }
  0x1f   : > { %1804 = vmatprep.subr.bf16.mxu1 %v1997_v3  ;;  %v650_v22 = vld [vmem:[%s432_s26] sm:$0xff] }
  0x21   : > { %1699 = vmatmul.mubr.msk.f32.vlgmr.msra.gmra.mrb[0].mxu1 %vm462_vm1, %v445_v10 }
  0x22   : > { %1806 = vmatpush3.bf16.msra.mxu1 %v1805_v11  ;;  %1709 = vmatprep.mubr.msk.f32.mxu1 %vm1998_vm0, %v1999_v6 }
  0x23   : > { %1807 = vmatprep.subr.bf16.mxu1 %v1997_v3 }
  0x26   : > { %1809 = vmatpush3.bf16.msra.mxu1 %v1808_v14 }
  0x27   : > { %1810 = vmatprep.subr.bf16.mxu1 %v1997_v3 }
  0x29   : > { %1710 = vmatmul.mubr.msk.f32.vlgmr.msra.gmra.mrb[2].mxu1 %vm462_vm1, %v446_v17 }
  0x2a   : > { %1812 = vmatpush3.bf16.msra.mxu1 %v1811_v18  ;;  %1720 = vmatprep.mubr.msk.f32.mxu1 %vm1998_vm0, %v1999_v6 }
  0x2b   : > { %1813 = vmatprep.subr.bf16.mxu1 %v1997_v3 }
  0x2e   : > { %1815 = vmatpush3.bf16.msra.mxu1 %v1814_v21 }
  0x2f   : > { %1723 = vmatprep.subr.mxu1 %v1999_v6 }
  0x31   : > { %1721 = vmatmul.mubr.msk.f32.vlgmr.msra.gmra.mrb[4].mxu1 %vm462_vm1, %v650_v22 }
  0x32   : > { %1725 = vmatprep.mubr.msk.f32.mxu1 %vm1998_vm0, %v1999_v6 }
  0xf4   : > { %v532_v24 = vpop.f32.mrb[0].mxu1 }
  0xf5   : > { %v533_v25 = vadd.f32 %v1619_v23, %v532_v24  ;;  %v1700_v26 = vpop.f32.mrb[1].mxu1 }
  0xf7   : > { %616 = vst.msk [vmem:[#allocation2] sm:$0xff] %vm462_vm1, %v533_v25  ;;  %619 = vrot.lane.b32.xlu0 %v533_v25, %s2392_s12  ;;  %640 = vrot.lane.b32.xlu1 %v533_v25, %s2001_s16 }
  0xfb   : > { %630 = vrot.lane.b32.xlu0 %v533_v25, %s2002_s15 }
  0xfc   : > { %v612_v28 = vpop.f32.mrb[2].mxu1 }
  0xfd   : > { %v2202_v29 = vadd.f32 %v1621_v27, %v612_v28  ;;  %v1711_v30 = vpop.f32.mrb[3].mxu1 }
  0xfe   : > { %v744_v31 = vld [vmem:[#allocation2] sm:$0xff] }
  0xff   : > { %617 = vst.msk [vmem:[#allocation3] sm:$0xff] %vm462_vm1, %v2202_v29  ;;  %1724 = vmatpush3.xpose.msk.msra.mxu1 %vm462_vm1, %v744_v31 }
 0x100   : > { %1728 = vmatprep.subr.mxu1 %v1999_v6 }
 0x104   : > { %v732_v33 = vpop.f32.mrb[4].mxu1 }
 0x105   : > { %v733_v34 = vadd.f32 %v1623_v32, %v732_v33  ;;  %v1722_v35 = vpop.f32.mrb[5].mxu1 }
 0x106   : > { %v748_v45 = vld [vmem:[#allocation3] sm:$0xff] }
 0x107   : > { %v736_v36 = vmul.f32 0.17677669, %v733_v34  ;;  %v1406_v35 = vld [vmem:[%s2389_s9] sm:$0xff] }
 0x109   : > { %740 = vrot.lane.b32.xlu0 %v736_v36, %s2002_s15  ;;  %738 = vrot.lane.b32.xlu1 %v736_v36, %s2392_s12 }
 0x10a   : > { %1726 = vmatmul.mubr.msk.f32.vlgmr.msra.gmra.mrb[6].mxu1 %vm462_vm1, %v736_v36 }
 0x10b   : > { %1730 = vmatprep.mubr.msk.f32.mxu1 %vm1998_vm0, %v1999_v6 }
 0x10d   : > { %742 = vrot.lane.b32.xlu1 %v736_v36, %s2001_s16  ;;  %v1407_v36 = vld [vmem:[%s2389_s9 + $0x8] sm:$0xff] }
 0x169   : > { %v620_v37 = vpop.permute.xlu0 %619  ;;  %v641_v38 = vpop.permute.xlu1 %640 }
 0x16a   : > { %623 = vst.msk [vmem:[#allocation2 + $0x8] sm:$0xff] %vm462_vm1, %v620_v37  ;;  %644 = vst.msk [vmem:[#allocation2 + $0x18] sm:$0xff] %vm462_vm1, %v641_v38  ;;  %v1408_v37 = vld [vmem:[%s2389_s9 + $0x10] sm:$0xff]  ;;  %v1817_v38 = vpack.c.bf16 %v1407_v36, %v1406_v35 }
 0x16d   : > { %v631_v39 = vpop.permute.xlu0 %630 }
 0x16e   : > { %634 = vst.msk [vmem:[#allocation2 + $0x10] sm:$0xff] %vm462_vm1, %v631_v39  ;;  %v1409_v39 = vld [vmem:[%s2389_s9 + $0x18] sm:$0xff] }
 0x171   : > { %v745_v40 = vld [vmem:[#allocation2 + $0x8] sm:$0xff]  ;;  %v747_v44 = vld [vmem:[#allocation2 + $0x18] sm:$0xff] }
 0x172   : > { %1729 = vmatpush3.xpose.msk.msra.mxu1 %vm462_vm1, %v745_v40  ;;  %v1820_v40 = vpack.c.bf16 %v1409_v39, %v1408_v37 }
 0x173   : > { %1738 = vmatprep.subr.mxu1 %v1999_v6 }
 0x175   : > { %v746_v41 = vld [vmem:[#allocation2 + $0x10] sm:$0xff] }
 0x176   : > { %1734 = vmatpush3.xpose.msk.msra.mxu0 %vm462_vm1, %v746_v41  ;;  %v1411_v41 = vld [vmem:[%s2389_s9 + $0x28] sm:$0xff] }
 0x177   : > { %1743 = vmatprep.subr.mxu0 %v1999_v6 }
 0x17b   : > { %v741_v42 = vpop.permute.xlu0 %740  ;;  %v739_v43 = vpop.permute.xlu1 %738 }
 0x17c   : > { %1731 = vmatmul.mubr.msk.f32.vlgmr.msra.gmra.mrb[8].mxu1 %vm462_vm1, %v739_v43  ;;  %1736 = vmatmul.mubr.msk.f32.vlgmr.msra.gmra.mrb[0].mxu0 %vm462_vm1, %v741_v42  ;;  %v1412_v43 = vld [vmem:[%s2389_s9 + $0x30] sm:$0xff] }
 0x17d   : > { %1739 = vmatpush3.xpose.msk.msra.mxu1 %vm462_vm1, %v747_v44  ;;  %1744 = vmatpush3.msra.mxu0 %v748_v45  ;;  %v1413_v44 = vld [vmem:[%s2389_s9 + $0x38] sm:$0xff] }
 0x17e   : > { %1740 = vmatprep.mubr.msk.f32.mxu1 %vm1998_vm0, %v1999_v6  ;;  %1748 = vmatprep.subr.mxu1 %v1999_v6  ;;  %v1826_v45 = vpack.c.bf16 %v1413_v44, %v1412_v43 }
 0x17f   : > { %v743_v46 = vpop.permute.xlu1 %742  ;;  %1745 = vmatprep.mubr.msk.f32.mxu0 %vm1998_vm0, %v1999_v6  ;;  %1753 = vmatprep.subr.mxu0 %v1999_v6 }
 0x180   : > { %1741 = vmatmul.mubr.msk.f32.vlgmr.msra.gmra.mrb[10].mxu1 %vm462_vm1, %v743_v46  ;;  %v1414_v46 = vld [vmem:[%s2389_s9 + $0x40] sm:$0xff] }
 0x181   : > { %1750 = vmatprep.mubr.msk.f32.mxu1 %vm1998_vm0, %v1999_v6 }
 0x1dd   : > { %v823_v47 = vpop.f32.mrb[6].mxu1 }
 0x1de   : > { %v1727_v48 = vpop.f32.mrb[7].mxu1  ;;  %v1053_v49 = vsel %vm1052_vm2, %v823_v47, -inf }
 0x1df   : > { %1054 = vmax.xlane.f32.xlu0 %v1053_v49  ;;  %v1416_v49 = vld [vmem:[%s2389_s9 + $0x50] sm:$0xff] }
 0x24f   : > { %v898_v50 = vpop.f32.mrb[8].mxu1  ;;  %v973_v51 = vpop.f32.mrb[0].mxu0 }
 0x250   : > { %v1732_v52 = vpop.f32.mrb[9].mxu1  ;;  %v1737_v53 = vpop.f32.mrb[1].mxu0  ;;  %v1059_v54 = vsel %vm1052_vm2, %v973_v51, -inf  ;;  %v1056_v55 = vsel %vm1052_vm2, %v898_v50, -inf }
 0x251   : > { %1060 = vmax.xlane.f32.xlu0 %v1059_v54  ;;  %1057 = vmax.xlane.f32.xlu1 %v1056_v55  ;;  %v1418_v54 = vld [vmem:[%s2389_s9 + $0x60] sm:$0xff]  ;;  %v1419_v55 = vld [vmem:[%s2389_s9 + $0x68] sm:$0xff] }
 0x253   : > { %v1048_v56 = vpop.f32.mrb[10].mxu1 }
 0x254   : > { %v1742_v57 = vpop.f32.mrb[11].mxu1  ;;  %v1062_v58 = vsel %vm1052_vm2, %v1048_v56, -inf }
 0x255   : > { %1063 = vmax.xlane.f32.xlu0 %v1062_v58  ;;  %v1420_v57 = vld [vmem:[%s2389_s9 + $0x70] sm:$0xff]  ;;  %v1421_v58 = vld [vmem:[%s2389_s9 + $0x78] sm:$0xff] }
 0x262   : > { %625 = vrot.lane.b32.xlu1 %v2202_v29, %s2392_s12 }
 0x26c   : > { %v1055_v59 = vpop.xlane.xlu0 %1054 }
 0x26d   : > { %v1065_v60 = vsub.f32 %v823_v47, %v1055_v59  ;;  %v1415_v47 = vld [vmem:[%s2389_s9 + $0x48] sm:$0xff]  ;;  %v1838_v59 = vpack.c.bf16 %v1421_v58, %v1420_v57 }
 0x26e   : > { %v1829_v48 = vpack.c.bf16 %v1415_v47, %v1414_v46 }
 0x26f   : > { %v1069_v61 = vmul.f32 1.442695, %v1065_v60 }
 0x271   : > { %1901 = vpow2.f32 %v1069_v61 }
 0x27b   : > { %v1902_v62 = vpop.eup %1901 }
 0x27c   : > { %v1077_v63 = vsel %vm1052_vm2, %v1902_v62, 0.0 }
 0x286   : > { %1078 = vadd.xlane.f32.xlu1 %v1077_v63 }
 0x2de   : > { %v1061_v0 = vpop.xlane.xlu0 %1060  ;;  %v1058_v1 = vpop.xlane.xlu1 %1057 }
 0x2df   : > { %v1067_v2 = vsub.f32 %v973_v51, %v1061_v0  ;;  %v1066_v4 = vsub.f32 %v898_v50, %v1058_v1  ;;  %v1417_v50 = vld [vmem:[%s2389_s9 + $0x58] sm:$0xff] }
 0x2e0   : > { %v1832_v53 = vpack.c.bf16 %v1417_v50, %v1416_v49 }
 0x2e1   : > { %v1073_v5 = vmul.f32 1.442695, %v1067_v2  ;;  %v1071_v7 = vmul.f32 1.442695, %v1066_v4 }
 0x2e2   : > { %v626_v8 = vpop.permute.xlu1 %625  ;;  %v1064_v9 = vpop.xlane.xlu0 %1063 }
 0x2e3   : > { %1903 = vpow2.f32 %v1073_v5  ;;  %629 = vst.msk [vmem:[#allocation3 + $0x8] sm:$0xff] %vm462_vm1, %v626_v8  ;;  %v1068_v10 = vsub.f32 %v1048_v56, %v1064_v9  ;;  %v1835_v56 = vpack.c.bf16 %v1419_v55, %v1418_v54  ;;  %v1637_v9 = vld [vmem:[%s2390_s10] ss:$0 sm:$0xff] }
 0x2e4   : > { %1905 = vpow2.f32 %v1071_v7 }
 0x2e5   : > { %v1075_v11 = vmul.f32 1.442695, %v1068_v10 }
 0x2e7   : > { %1907 = vpow2.f32 %v1075_v11 }
 0x2ea   : > { %v749_v12 = vld [vmem:[#allocation3 + $0x8] sm:$0xff] }
 0x2eb   : > { %1749 = vmatpush3.msra.mxu1 %v749_v12 }
 0x2ec   : > { %1758 = vmatprep.subr.mxu1 %v1999_v6 }
 0x2ed   : > { %v1904_v13 = vpop.eup %1903 }
 0x2ee   : > { %v1906_v14 = vpop.eup %1905  ;;  %v1083_v15 = vsel %vm1052_vm2, %v1904_v13, 0.0 }
 0x2ef   : > { %1084 = vadd.xlane.f32.xlu1 %v1083_v15  ;;  %v1080_v16 = vsel %vm1052_vm2, %v1906_v14, 0.0 }
 0x2f0   : > { %1081 = vadd.xlane.f32.xlu0 %v1080_v16 }
 0x2f1   : > { %v1908_v17 = vpop.eup %1907 }
 0x2f2   : > { %v1086_v18 = vsel %vm1052_vm2, %v1908_v17, 0.0 }
 0x2f4   : > { %1087 = vadd.xlane.f32.xlu0 %v1086_v18 }
 0x300   : > { %645 = vrot.lane.b32.xlu1 %v2202_v29, %s2001_s16 }
 0x30a   : > { %635 = vrot.lane.b32.xlu0 %v2202_v29, %s2002_s15 }
 0x313   : > { %v1079_v19 = vpop.xlane.xlu1 %1078 }
 0x314   : > { %1909 = vrcp.f32 %v1079_v19 }
 0x31e   : > { %v1910_v20 = vpop.eup %1909 }
 0x31f   : > { %v1093_v21 = vmul.f32 %v1910_v20, %v1902_v62 }
 0x321   : > { %1746 = vmatmul.mubr.msk.f32.vlgmr.msra.gmra.mrb[2].mxu0 %vm1052_vm2, %v1093_v21 }
 0x322   : > { %1755 = vmatprep.mubr.msk.f32.mxu0 %vm1998_vm0, %v1999_v6 }
 0x37c   : > { %v1085_v22 = vpop.xlane.xlu1 %1084 }
 0x37d   : > { %v1082_v23 = vpop.xlane.xlu0 %1081 }
 0x37e   : > { %1911 = vrcp.f32 %v1082_v23 }
 0x37f   : > { %1913 = vrcp.f32 %v1085_v22 }
 0x380   : > { %v646_v24 = vpop.permute.xlu1 %645 }
 0x381   : > { %649 = vst.msk [vmem:[#allocation3 + $0x18] sm:$0xff] %vm462_vm1, %v646_v24  ;;  %v1088_v25 = vpop.xlane.xlu0 %1087 }
 0x382   : > { %1915 = vrcp.f32 %v1088_v25 }
 0x385   : > { %v636_v26 = vpop.permute.xlu0 %635 }
 0x386   : > { %639 = vst.msk [vmem:[#allocation3 + $0x10] sm:$0xff] %vm462_vm1, %v636_v26 }
 0x388   : > { %v1912_v27 = vpop.eup %1911  ;;  %v751_v29 = vld [vmem:[#allocation3 + $0x18] sm:$0xff] }
 0x389   : > { %v1094_v28 = vmul.f32 %v1912_v27, %v1906_v14  ;;  %v1914_v30 = vpop.eup %1913 }
 0x38a   : > { %v1095_v32 = vmul.f32 %v1914_v30, %v1904_v13 }
 0x38b   : > { %1751 = vmatmul.mubr.msk.f32.vlgmr.msra.gmra.mrb[12].mxu1 %vm1052_vm2, %v1094_v28 }
 0x38c   : > { %v1916_v31 = vpop.eup %1915  ;;  %1759 = vmatpush3.msra.mxu1 %v751_v29  ;;  %1760 = vmatprep.mubr.msk.f32.mxu1 %vm1998_vm0, %v1999_v6 }
 0x38d   : > { %v1096_v33 = vmul.f32 %v1916_v31, %v1908_v17  ;;  %v750_v34 = vld [vmem:[#allocation3 + $0x10] sm:$0xff] }
 0x38e   : > { %1754 = vmatpush3.msra.mxu0 %v750_v34 }
 0x38f   : > { %1756 = vmatmul.mubr.msk.f32.vlgmr.msra.gmra.mrb[4].mxu0 %vm1052_vm2, %v1095_v32  ;;  %1761 = vmatmul.mubr.msk.f32.vlgmr.msra.gmra.mrb[14].mxu1 %vm1052_vm2, %v1096_v33 }
 0x390   : > { %1816 = vmatprep.subr.bf16.mxu0 %v1997_v3  ;;  %1795 = vmatprep.mubr.msk.f32.mxu0 %vm1998_vm0, %v1999_v6  ;;  %v1410_v6 = vld [vmem:[%s2389_s9 + $0x20] sm:$0xff] }
 0x391   : > { %1818 = vmatpush3.bf16.msra.mxu0 %v1817_v38  ;;  %v1823_v42 = vpack.c.bf16 %v1411_v41, %v1410_v6 }
 0x392   : > { %1819 = vmatprep.subr.bf16.mxu0 %v1997_v3 }
 0x395   : > { %1821 = vmatpush3.bf16.msra.mxu0 %v1820_v40 }
 0x396   : > { %1822 = vmatprep.subr.bf16.mxu0 %v1997_v3 }
 0x399   : > { %1824 = vmatpush3.bf16.msra.mxu0 %v1823_v42 }
 0x39a   : > { %1825 = vmatprep.subr.bf16.mxu0 %v1997_v3 }
 0x39d   : > { %1827 = vmatpush3.bf16.msra.mxu0 %v1826_v45 }
 0x39e   : > { %1828 = vmatprep.subr.bf16.mxu0 %v1997_v3 }
 0x3a1   : > { %1830 = vmatpush3.bf16.msra.mxu0 %v1829_v48 }
 0x3a2   : > { %1831 = vmatprep.subr.bf16.mxu0 %v1997_v3 }
 0x3a5   : > { %1833 = vmatpush3.bf16.msra.mxu0 %v1832_v53 }
 0x3a6   : > { %1834 = vmatprep.subr.bf16.mxu0 %v1997_v3 }
 0x3a9   : > { %1836 = vmatpush3.bf16.msra.mxu0 %v1835_v56 }
 0x3aa   : > { %1837 = vmatprep.subr.bf16.mxu0 %v1997_v3 }
 0x3ad   : > { %1839 = vmatpush3.bf16.msra.mxu0 %v1838_v59 }
 0x3f4   : > { %v1166_v51 = vpop.f32.mrb[2].mxu0 }
 0x3f5   : > { %v1747_v52 = vpop.f32.mrb[3].mxu0 }
 0x45e   : > { %v1239_v60 = vpop.f32.mrb[12].mxu1 }
 0x45f   : > { %1390 = vrot.lane.b32.xlu1 %v1239_v60, %s2001_s16  ;;  %v1752_v61 = vpop.f32.mrb[13].mxu1  ;;  %s423_s16 = sand.u32 1, %s1979_s18  }
 0x460   : > { %s1615_s28 = sshll.u32 %s423_s16, 3 }
 0x461   : > { %s425_s24 = scalar_lea.vmem [#allocation4], %s1615_s28  ;;  %s1921_s28 = sshll.u32 %s2003_s20, 4  ;;  %s1922_s28 = int_to_ptr.vmem [resolvable:$false] %s1921_s28 }
 0x462   : > { %v1312_v62 = vpop.f32.mrb[4].mxu0  ;;  %v1385_v63 = vpop.f32.mrb[14].mxu1  ;;  %s1515_s26 = sshll.u32 %s425_s24, 4  ;;  %s2334_s26 = int_to_ptr.vmem [resolvable:$true] %s1515_s26 }
 0x463   : > { %1394 = vrot.lane.b32.xlu0 %v1312_v62, %s2002_s15  ;;  %v1757_v3 = vpop.f32.mrb[5].mxu0  ;;  %1398 = vrot.lane.b32.xlu1 %v1385_v63, %s2399_s14  ;;  %v1762_v0 = vpop.f32.mrb[15].mxu1  ;;  %s1501_s14 = scalar_lea.sflag [#allocation5], %s423_s16  ;;  %s1917_s12 = scalar_lea.vmem %s2334_s26, 128 }
 0x464   : > { %p1918_p12 = scmp.ne.s32.totalorder %s2334_s26, %s1917_s12  ;;  %s1923_s15 = scalar_lea.vmem %s1922_s28, 256 }
 0x465   : > { %p1924_p1 = scmp.lt.s32.totalorder %s2334_s26, %s1922_s28  ;;  %p1925_p2 = scmp.lt.s32.totalorder %s1923_s15, %s1917_s12 }
 0x466   : > { %p1919_p13 = pnand %p1918_p12, %p2104_p4 }
 0x467   : > { %p1926_p3 = por %p1925_p2, %p1924_p1 }
 0x468   : > { %p1920_p0 = pneg %p1919_p13 }
 0x46a   : > { %p1927_p5 = pnand %p1926_p3, %p1920_p0 }
 0x4d1   : > { %v1391_v1 = vpop.permute.xlu1 %1390 }
 0x4d2   : > { %v1401_v2 = vsel %vm462_vm1, %v1166_v51, %v1391_v1 }
 0x4d5   : > { %v1395_v4 = vpop.permute.xlu0 %1394  ;;  %v1399_v5 = vpop.permute.xlu1 %1398 }
 0x4d6   : > { %v1403_v7 = vsel %vm1402_vm3, %v1401_v2, %v1395_v4 }
 0x4d7   : > { %v1405_v8 = vsel %vm1404_vm4, %v1403_v7, %v1399_v5 }
 0x4d8   : > { %1796 = vmatmul.mubr.f32.vlgmr.msra.gmra.mrb[6].mxu0 %v1405_v8 }
 0x5ab   : > { %v1495_v10 = vpop.f32.mrb[6].mxu0 }
 0x5ac   : > { %v1496_v11 = vadd.f32 %v1637_v9, %v1495_v10  ;;  %v1797_v12 = vpop.f32.mrb[7].mxu0 }
 0x5ae   : > { %1499 = vst.msk [vmem:[%s425_s24] sm:$0xff] %vm462_vm1, %v1496_v11 }
 0x5af   : > { %1930 = shalt.err (!%p1927_p5)
}
 0x5b0   : > { %s1931_s16 = scalar_lea.hbm %s2332_s13, 128  ;;  %s1935_s1 = scalar_lea.hbm %s2391_s11, 256 }
 0x5b1   : > { %p1932_p6 = scmp.ne.s32.totalorder %s2332_s13, %s1931_s16  ;;  %p1936_p10 = scmp.lt.u32.totalorder %s2332_s13, %s2391_s11 }
 0x5b2   : > { %p1937_p11 = scmp.lt.u32.totalorder %s1935_s1, %s1931_s16  ;;  %p1939_p13 = scmp.lt.u32.totalorder %s1931_s16, %s2332_s13 }
 0x5b3   : > { %p1933_p7 = pnand %p1932_p6, %p2104_p4 }
 0x5b4   : > { %p1938_p12 = por %p1937_p11, %p1936_p10 }
 0x5b5   : > { %p1934_p9 = pneg %p1933_p7 }
 0x5b6   : > { %p1940_p0 = por %p1939_p13, %p1938_p12 }
 0x5b8   : > { %p1941_p1 = pnand %p1940_p0, %p1934_p9 }
 0x5ba   : > { %1944 = shalt.err (!%p1941_p1)
}
 0x5bb   : > { %1840 = dma.vmem_to_hbm [thread:$0]  (%p2104_p4), %s2334_s26, 128, %s2332_s13, %s1501_s14  }
 0x5bc PF: > { %p1846_p2 = scmp.ge.s32.totalorder %s1995_s22, 2  ;;  %s1527_s12 = sand.u32 1, %s1975_s17  }
 0x5bd   : > { %s1528_s28 = scalar_lea.sflag [#allocation5], %s1527_s12 }
 0x5be   : > { %p1843_p3 = pnand %p1846_p2, %p2111_p8 }
 0x5c0   : > { %1970 = dma.done.wait (!%p1843_p3), %s1528_s28, 128  }
 0x5c1   : > { %1972 = vsyncadd (!%p1843_p3), %s1528_s28, 4294967168  ;;  %s24_s22 = sadd.s32 1, %s1995_s22   ;;  %s2400_s17 = smov %s1979_s18 }
 0x5c2   : > { %p21_p5 = scmp.ge.s32.totalorder %s24_s22, 4   ;;  %s2401_s18 = smov %s1983_s19 }
 0x5c3   : > { %s2402_s19 = smov %s2117_s30  ;;  %s2403_s20 = smov %s1991_s21 }
 0x5c4   : > { %s2404_s21 = smov %s2406_s25  ;;  %23 = sbr.rel (!%p21_p5) target bundleno = 7 (0x7), region = 115 }
 0x5cb   :  { %1533 = vsyncpa [#allocation5], 1 }
 0x5cc   :  { %1535 = vsyncpa [#allocation5 + $0x1], 1 }

</bundles_post_ra>
